<compile_context>
chip_gen: v5e
topology: v5e:2x2
jax: 0.10.0
libtpu: 0.0.40
codegen_flags: <defaults>
</compile_context>

<pallas_src>
import inspect

import jax
import jax.numpy as jnp
from jax import lax
from jax.experimental import pallas as pl
from jax.experimental.pallas import tpu as pltpu


def _round_up(x, m):
    return (x + m - 1) // m * m


# ---------------------------------------------------------------------------
# Kernel
# ---------------------------------------------------------------------------
def _vq_kernel(z_ref, w_ref, wsq_ref, q_ref, counts_ref):
    """One row-tile: distances -> argmin -> one-hot -> codebook gather + histogram."""
    z = z_ref[...]                       # (TN, D)  native dtype (f32 / bf16)
    w = w_ref[...]                       # (K, D)   native dtype
    wsq = wsq_ref[...]                   # (1, K)   f32 precomputed |w|^2
    tn = z.shape[0]
    k = w.shape[0]

    # dist = |w|^2 - 2 z.w  (contract D of both operands: codebook stays (K, D),
    # no transposed copy; MXU accumulates in f32).
    zw = lax.dot_general(z, w, dimension_numbers=(((1,), (1,)), ((), ())),
                         preferred_element_type=jnp.float32)            # (TN, K)
    dist = wsq - 2.0 * zw

    # argmin over K with first-occurrence tie-break (matches torch.argmin).
    min_val = jnp.min(dist, axis=1, keepdims=True)                      # (TN, 1)
    col = lax.broadcasted_iota(jnp.int32, (tn, k), 1)                   # (TN, K)
    idx = jnp.min(jnp.where(dist <= min_val, col, k),
                  axis=1, keepdims=True)                                # (TN, 1)
    one_hot = col == idx                                                # (TN, K) bool

    # quantized = one_hot @ codebook (MXU row gather) in the codebook's native dtype.
    q = jnp.dot(one_hot.astype(w.dtype), w, preferred_element_type=jnp.float32)
    q_ref[...] = q.astype(q_ref.dtype)

    # Per-tile code histogram folded to (8, K): tiny, sublane-aligned write.
    counts_ref[0] = jnp.sum(one_hot.astype(jnp.float32).reshape(tn // 8, 8, k),
                            axis=0)


# ---------------------------------------------------------------------------
# Tiling / feature helpers
# ---------------------------------------------------------------------------
def _vmem_budget_bytes():
    """VMEM budget: stay well inside v7x's 64 MiB; use more where available."""
    try:
        cap = int(pltpu.get_tpu_info().vmem_capacity_bytes)
    except Exception:
        cap = 64 * 1024 * 1024                     # v7x-safe fallback
    return max(24 << 20, min(int(cap * 0.6), 80 << 20))


def _pick_tile(n8, target):
    """Largest row tile <= target; prefer one that divides n8 (no jnp.pad pass)
    and yields >= 2 grid steps (so both v7x TensorCores get work)."""
    target = max(8, min(int(target), n8))
    t = (target // 8) * 8
    cand = t
    while cand >= 8:
        if n8 % cand == 0 and (n8 // cand >= 2 or n8 <= 8):
            if cand * 4 >= t:                      # accept divisors within 4x of target
                return cand
            break
        cand -= 8
    if n8 >= 16:                                   # ragged: pad, but keep >= 2 tiles
        t = min(t, max(8, (n8 // 2) // 8 * 8))
    return max(8, t)


def _supports_pipeline_mode():
    try:
        return hasattr(pl, "Buffered") and (
            "pipeline_mode" in inspect.signature(pl.BlockSpec).parameters)
    except (TypeError, ValueError):
        return False


# ---------------------------------------------------------------------------
# Wrapper
# ---------------------------------------------------------------------------
def vector_quantizer_ema_forward(z, codebook):
    """Eval-mode VQ-EMA forward. z: (N, D), codebook: (K, D) -> (quantized, perplexity)."""
    n, d = z.shape
    k, d2 = codebook.shape
    assert d == d2

    n8 = _round_up(n, 8)
    budget = _vmem_budget_bytes()

    # --- row-tile selection from the VMEM budget -----------------------------
    d_lanes = _round_up(d, 128)              # minor dim < 128 is lane-padded in VMEM
    k_lanes = _round_up(k, 128)
    z_isz = jnp.dtype(z.dtype).itemsize
    w_isz = jnp.dtype(codebook.dtype).itemsize
    # Constant-resident blocks (codebook, |w|^2, counts), counted double-buffered.
    const_bytes = 2 * k * d_lanes * w_isz + 4 * k_lanes * 4 + 2 * 8 * k_lanes * 4
    avail = max(budget - const_bytes, 4 << 20)
    # ~5 live (row, K) f32/i32 intermediates + double-buffered z / quantized rows.
    per_row = 5 * k_lanes * 4 + 2 * d_lanes * z_isz + 2 * d_lanes * z_isz
    tile_n = _pick_tile(n8, min(4096, avail // per_row))
    n_pad = _round_up(n8, tile_n)
    num_tiles = n_pad // tile_n

    # Pad only when unavoidable (tile does not divide the row count).
    z_p = z if n_pad == n else jnp.pad(z, ((0, n_pad - n), (0, 0)))

    # |w|^2 hoisted out of the grid loop, always f32.
    w_sq = jnp.sum(codebook.astype(jnp.float32) ** 2, axis=1)[None, :]   # (1, K)

    # Constant-index inputs: single-buffer when the installed jax supports it.
    if _supports_pipeline_mode():
        w_spec = pl.BlockSpec((k, d), lambda i: (0, 0), pipeline_mode=pl.Buffered(1))
        wsq_spec = pl.BlockSpec((1, k), lambda i: (0, 0), pipeline_mode=pl.Buffered(1))
    else:
        w_spec = pl.BlockSpec((k, d), lambda i: (0, 0))
        wsq_spec = pl.BlockSpec((1, k), lambda i: (0, 0))

    cost = pl.CostEstimate(
        flops=4 * n_pad * d * k,                         # z@w^T and one_hot@w
        transcendentals=0,
        bytes_accessed=int(2 * n_pad * d * z_isz + k * d * w_isz
                           + k * 4 + num_tiles * 8 * k * 4))

    quantized_p, counts_tiles = pl.pallas_call(
        _vq_kernel,
        out_shape=(
            jax.ShapeDtypeStruct((n_pad, d), z.dtype),               # quantized
            jax.ShapeDtypeStruct((num_tiles, 8, k), jnp.float32),    # per-tile histograms
        ),
        grid_spec=pltpu.PrefetchScalarGridSpec(
            num_scalar_prefetch=0,
            grid=(num_tiles,),
            in_specs=[
                pl.BlockSpec((tile_n, d), lambda i: (i, 0)),         # z row tile
                w_spec,                                              # codebook (constant)
                wsq_spec,                                            # |w|^2   (constant)
            ],
            out_specs=[
                pl.BlockSpec((tile_n, d), lambda i: (i, 0)),         # quantized tile
                pl.BlockSpec((1, 8, k), lambda i: (i, 0, 0)),        # per-tile counts
            ],
        ),
        compiler_params=pltpu.CompilerParams(
            # No cross-step state -> row tiles shard across both TCs on v7x.
            dimension_semantics=("parallel",),
            vmem_limit_bytes=int(budget),
        ),
        cost_estimate=cost,
    )(z_p, codebook, w_sq)

    # --- tiny epilogue in plain JAX ------------------------------------------
    counts = jnp.sum(counts_tiles, axis=(0, 1))                       # (K,)
    pad = n_pad - n
    if pad:
        # Padded (all-zero) rows land exactly on argmin(|w|^2); remove them here
        # instead of burning a (TN, K) mask per tile inside the kernel.
        counts = counts.at[jnp.argmin(w_sq[0])].add(-float(pad))
    avg_probs = counts / jnp.float32(n)
    perplexity = jnp.exp(-jnp.sum(avg_probs * jnp.log(avg_probs + 1e-10)))

    quantized = quantized_p[:n]
    # Straight-through estimator: forward value == quantized, gradient flows to z.
    quantized = z + lax.stop_gradient(quantized - z)
    return quantized, perplexity


# ---------------------------------------------------------------------------
# Pure-JAX reference (matches the torch module's eval forward)
# ---------------------------------------------------------------------------
def _reference(z, codebook):
    dist = (jnp.sum(z ** 2, axis=1, keepdims=True)
            + jnp.sum(codebook ** 2, axis=1)
            - 2.0 * z @ codebook.T)
    idx = jnp.argmin(dist, axis=1)
    enc = jax.nn.one_hot(idx, codebook.shape[0], dtype=jnp.float32)
    quantized = enc @ codebook
    avg_probs = jnp.mean(enc, axis=0)
    perplexity = jnp.exp(-jnp.sum(avg_probs * jnp.log(avg_probs + 1e-10)))
    return quantized, perplexity


if __name__ == "__main__":
    # Module config (synthetic, deterministic init instead of torch.load).
    num_embeddings = 128   # K
    embedding_dim = 32     # D

    key = jax.random.PRNGKey(0)
    k_cb, k_z = jax.random.split(key)

    codebook = jax.random.normal(k_cb, (num_embeddings, embedding_dim),
                                 dtype=jnp.float32)

    # Example input: (B, H, W, D) = (2, 8, 8, 32) flattened to (N, D) = (128, 32).
    b, h, w = 2, 8, 8
    z_nhwc = jax.random.normal(k_z, (b, h, w, embedding_dim), dtype=jnp.float32)
    z = z_nhwc.reshape(-1, embedding_dim)

    fwd = jax.jit(vector_quantizer_ema_forward)
    quantized, perplexity = fwd(z, codebook)
    jax.block_until_ready((quantized, perplexity))

    q_ref, p_ref = _reference(z, codebook)
    assert jnp.allclose(quantized, q_ref, atol=1e-4, rtol=1e-4)
    assert jnp.allclose(perplexity, p_ref, atol=1e-4, rtol=1e-4)

    print("KERNEL_OK")
</pallas_src>

<mosaic_0001>
module attributes {stable_mosaic.version = 11 : i64} {
  func.func @_vq_kernel(%arg0: i32, %arg1: memref<64x32xf32, #tpu.memory_space<vmem>>, %arg2: memref<128x32xf32, #tpu.memory_space<vmem>>, %arg3: memref<1x128xf32, #tpu.memory_space<vmem>>, %arg4: memref<64x32xf32, #tpu.memory_space<vmem>>, %arg5: memref<1x8x128xf32, #tpu.memory_space<vmem>>) attributes {dimension_semantics = [#tpu.dimension_semantics<parallel>], iteration_bounds = array<i64: 2>, scalar_prefetch = 0 : i64, scratch_operands = 0 : i64, tpu.core_type = #tpu.core_type<tc>, window_params = [{transform_indices = @transform_0, window_bounds = array<i64: 64, 32>}, {pipeline_mode = #tpu.pipeline_mode<synchronous>, transform_indices = @transform_1, window_bounds = array<i64: 128, 32>}, {pipeline_mode = #tpu.pipeline_mode<synchronous>, transform_indices = @transform_2, window_bounds = array<i64: 1, 128>}, {transform_indices = @transform_3, window_bounds = array<i64: 64, 32>}, {transform_indices = @transform_4, window_bounds = array<i64: 1, 8, 128>}]} {
    %c0 = arith.constant 0 : index
    %c0_0 = arith.constant 0 : index
    %0 = vector.load %arg1[%c0, %c0_0] : memref<64x32xf32, #tpu.memory_space<vmem>>, vector<64x32xf32>
    %c0_1 = arith.constant 0 : index
    %c0_2 = arith.constant 0 : index
    %1 = vector.load %arg2[%c0_1, %c0_2] : memref<128x32xf32, #tpu.memory_space<vmem>>, vector<128x32xf32>
    %c0_3 = arith.constant 0 : index
    %c0_4 = arith.constant 0 : index
    %2 = vector.load %arg3[%c0_3, %c0_4] : memref<1x128xf32, #tpu.memory_space<vmem>>, vector<1x128xf32>
    %cst = arith.constant dense<0.000000e+00> : vector<64x128xf32>
    %3 = tpu.matmul %0, %1, %cst {dimension_numbers = #tpu.dot_dimension_numbers<[1], [1], [0], [0], [0, 0, 1, 0], [], []>} : vector<64x32xf32>, vector<128x32xf32>, vector<64x128xf32> -> vector<64x128xf32>
    %cst_5 = arith.constant 2.000000e+00 : f32
    %4 = vector.broadcast %cst_5 : f32 to vector<64x128xf32>
    %5 = arith.mulf %4, %3 : vector<64x128xf32>
    %6 = vector.broadcast %2 : vector<1x128xf32> to vector<64x128xf32>
    %7 = arith.subf %6, %5 : vector<64x128xf32>
    %cst_6 = arith.constant dense<0x7F800000> : vector<64xf32>
    %8 = vector.multi_reduction <minimumf>, %7, %cst_6 [1] : vector<64x128xf32> to vector<64xf32>
    %9 = vector.shape_cast %8 : vector<64xf32> to vector<64x1xf32>
    %10 = tpu.iota {dimensions = array<i32: 1>} : vector<64x128xi32>
    %11 = vector.broadcast %9 : vector<64x1xf32> to vector<64x128xf32>
    %12 = arith.cmpf ole, %7, %11 : vector<64x128xf32>
    %c128_i32 = arith.constant 128 : i32
    %13 = vector.broadcast %c128_i32 : i32 to vector<64x128xi32>
    %14 = arith.select %12, %10, %13 : vector<64x128xi1>, vector<64x128xi32>
    %cst_7 = arith.constant dense<2147483647> : vector<64xi32>
    %15 = vector.multi_reduction <minsi>, %14, %cst_7 [1] : vector<64x128xi32> to vector<64xi32>
    %16 = vector.shape_cast %15 : vector<64xi32> to vector<64x1xi32>
    %17 = vector.broadcast %16 : vector<64x1xi32> to vector<64x128xi32>
    %18 = arith.cmpi eq, %10, %17 : vector<64x128xi32>
    %19 = arith.extui %18 : vector<64x128xi1> to vector<64x128xi32>
    %20 = arith.sitofp %19 : vector<64x128xi32> to vector<64x128xf32>
    %cst_8 = arith.constant dense<0.000000e+00> : vector<64x32xf32>
    %21 = tpu.matmul %20, %1, %cst_8 {dimension_numbers = #tpu.dot_dimension_numbers<[1], [0], [0], [1], [0, 0, 1, 1], [], []>} : vector<64x128xf32>, vector<128x32xf32>, vector<64x32xf32> -> vector<64x32xf32>
    %c0_9 = arith.constant 0 : index
    %c0_10 = arith.constant 0 : index
    %22 = vector.load %arg4[%c0_9, %c0_10] : memref<64x32xf32, #tpu.memory_space<vmem>>, vector<64x32xf32>
    tpu.vector_store %arg4[%c0_9, %c0_10], %21 {strides = array<i32>} : memref<64x32xf32, #tpu.memory_space<vmem>>, vector<64x32xf32>,
    %23 = arith.extui %18 : vector<64x128xi1> to vector<64x128xi32>
    %24 = arith.sitofp %23 : vector<64x128xi32> to vector<64x128xf32>
    %25 = vector.shape_cast %24 : vector<64x128xf32> to vector<8x8x128xf32>
    %cst_11 = arith.constant dense<0.000000e+00> : vector<8x128xf32>
    %26 = vector.multi_reduction <add>, %25, %cst_11 [0] : vector<8x8x128xf32> to vector<8x128xf32>
    %c0_12 = arith.constant 0 : index
    %c0_13 = arith.constant 0 : index
    %c0_14 = arith.constant 0 : index
    %27 = vector.load %arg5[%c0_12, %c0_13, %c0_14] : memref<1x8x128xf32, #tpu.memory_space<vmem>>, vector<1x8x128xf32>
    %28 = vector.shape_cast %27 : vector<1x8x128xf32> to vector<8x128xf32>
    %29 = vector.shape_cast %26 : vector<8x128xf32> to vector<1x8x128xf32>
    tpu.vector_store %arg5[%c0_12, %c0_13, %c0_14], %29 {strides = array<i32>} : memref<1x8x128xf32, #tpu.memory_space<vmem>>, vector<1x8x128xf32>,
    return
  }
  func.func @transform_0(%arg0: i32) -> (i32, i32) {
    %c0_i32 = arith.constant 0 : i32
    %c0_i32_0 = arith.constant 0 : i32
    return %arg0, %c0_i32 : i32, i32
  }
  func.func @transform_1(%arg0: i32) -> (i32, i32) {
    %c0_i32 = arith.constant 0 : i32
    %c0_i32_0 = arith.constant 0 : i32
    %c0_i32_1 = arith.constant 0 : i32
    return %c0_i32, %c0_i32_0 : i32, i32
  }
  func.func @transform_2(%arg0: i32) -> (i32, i32) {
    %c0_i32 = arith.constant 0 : i32
    %c0_i32_0 = arith.constant 0 : i32
    %c0_i32_1 = arith.constant 0 : i32
    return %c0_i32, %c0_i32_0 : i32, i32
  }
  func.func @transform_3(%arg0: i32) -> (i32, i32) {
    %c0_i32 = arith.constant 0 : i32
    %c0_i32_0 = arith.constant 0 : i32
    return %arg0, %c0_i32 : i32, i32
  }
  func.func @transform_4(%arg0: i32) -> (i32, i32, i32) {
    %c0_i32 = arith.constant 0 : i32
    %c0_i32_0 = arith.constant 0 : i32
    %c0_i32_1 = arith.constant 0 : i32
    return %arg0, %c0_i32, %c0_i32_0 : i32, i32, i32
  }
}

</mosaic_0001>

<bundles_post_ra>
// kernel: vector_quantizer_ema_forward.1
= control target key start
LH: loop header
LB: loop body
LE: loop exit
PB: predicated region body
PF: predicated region fallthrough
CT: control target
= control target key end

     0   :  { %s814_s15 = smov 0   ;;  %s1003_s0 = inlined_call_operand.vmem [shape: f32[128,32], index: 0, kind: input, shape index: {}]   ;;  %s1004_s1 = inlined_call_operand.vmem [shape: f32[128,32], index: 1, kind: input, shape index: {}]   ;;  %s1005_s2 = inlined_call_operand.vmem [shape: f32[1,128], index: 2, kind: input, shape index: {}]   ;;  %s1006_s3 = inlined_call_operand.vmem [shape: f32[128,32], index: 3, kind: output, shape index: {0}]   ;;  %s1007_s4 = inlined_call_operand.vmem [shape: f32[2,8,128], index: 4, kind: output, shape index: {1}]  }
   0x1 LB: > { %s820_s16 = sadd.s32 4294967295, %s785_s15   ;;  %p688_p0 = scmp.ge.s32.totalorder %s785_s15, 1  ;;  %s785_s15 = sphi %s814_s15, %s15_s15  }
   0x2   : > { %p166_p1 = scmp.lt.s32.totalorder %s785_s15, 3 }
   0x4   : > { %p167_p2 = pnand %p688_p0, %p166_p1 }
   0x5   : > { %s689_s25 = sshll.u32 (!%p167_p2), %s820_s16, 3  ;;  %p208_p4 = scmp.lt.s32.totalorder (!%p167_p2), %s820_s16, 1 }
   0x6   : > { %170 = sbr.rel (%p167_p2) target bundleno = 823 (0x337), region = 32  ;;  %p197_p3 = scmp.lt.s32.totalorder (!%p167_p2), %s689_s25, 15 }
   0xb   : > { %v235_v0 = vld [vmem:[%s1004_s1 + $0x78] sm:$0xff]  ;;  %vm237_vm0 = vcmask 261120   ;;  %v234_v1 = vld [vmem:[%s1004_s1 + $0x70] sm:$0xff]  ;;  %v233_v2 = vld [vmem:[%s1004_s1 + $0x68] sm:$0xff]  ;;  %s1009_s25 = smov (!%p197_p3, %s689_s25), 15  ;;  %v386_v46 = vlaneseq  ;;  %s1011_s16 = smov (!%p208_p4, %s820_s16), 1 }
   0xc   : > { %694 = vmatpush.xpose.msk.msra.mxu0 %vm237_vm0, %v235_v0  ;;  %736 = vmatpush.xpose.msk.msra.mxu2 %vm237_vm0, %v235_v0  ;;  %v232_v3 = vld [vmem:[%s1004_s1 + $0x60] sm:$0xff]  ;;  %v231_v4 = vld [vmem:[%s1004_s1 + $0x58] sm:$0xff]  ;;  %v230_v5 = vld [vmem:[%s1004_s1 + $0x50] sm:$0xff]  ;;  %s690_s26 = sshll.u32 %s1009_s25, 3  ;;  %s693_s9 = sshll.u32 %s1011_s16, 3 }
   0xd   : > { %737 = vmatpush.xpose.msk.msra.mxu3 %vm237_vm0, %v235_v0  ;;  %540 = vmatpush.msra.mxu1 %v235_v0  ;;  %v229_v6 = vld [vmem:[%s1004_s1 + $0x48] sm:$0xff]  ;;  %v228_v7 = vld [vmem:[%s1004_s1 + $0x40] sm:$0xff]  ;;  %v227_v8 = vld [vmem:[%s1004_s1 + $0x38] sm:$0xff]  ;;  %s200_s29 = scalar_lea.vmem %s1003_s0, %s690_s26  ;;  %v940_v47 = vand.u32 127, %v386_v46  ;;  %s206_s8 = scalar_lea.vmem %s1006_s3, %s690_s26 }
   0xe   : > { %v226_v9 = vld [vmem:[%s1004_s1 + $0x30] sm:$0xff]  ;;  %v225_v10 = vld [vmem:[%s1004_s1 + $0x28] sm:$0xff]  ;;  %v224_v11 = vld [vmem:[%s1004_s1 + $0x20] sm:$0xff]  ;;  %s211_s12 = scalar_lea.vmem %s1007_s4, %s693_s9 }
   0xf   : > { %541 = vmatpush.msra.mxu1 %v234_v1  ;;  %v223_v12 = vld [vmem:[%s1004_s1 + $0x18] sm:$0xff]  ;;  %v222_v13 = vld [vmem:[%s1004_s1 + $0x10] sm:$0xff]  ;;  %v221_v14 = vld [vmem:[%s1004_s1 + $0x8] sm:$0xff] }
  0x10   : > { %695 = vmatpush.xpose.msk.msra.mxu0 %vm237_vm0, %v234_v1  ;;  %738 = vmatpush.xpose.msk.msra.mxu2 %vm237_vm0, %v234_v1  ;;  %v220_v15 = vld [vmem:[%s1004_s1] sm:$0xff]  ;;  %v213_v17 = vld [vmem:[%s200_s29 + $0x8] sm:$0xff]  ;;  %v214_v19 = vld [vmem:[%s200_s29 + $0x10] sm:$0xff] }
  0x11   : > { %739 = vmatpush.xpose.msk.msra.mxu3 %vm237_vm0, %v234_v1  ;;  %542 = vmatpush.msra.mxu1 %v233_v2  ;;  %v212_v16 = vld [vmem:[%s200_s29] sm:$0xff]  ;;  %v217_v20 = vld [vmem:[%s200_s29 + $0x28] sm:$0xff]  ;;  %v215_v21 = vld [vmem:[%s200_s29 + $0x18] sm:$0xff] }
  0x12   : > { %v216_v18 = vld [vmem:[%s200_s29 + $0x20] sm:$0xff]  ;;  %v218_v22 = vld [vmem:[%s200_s29 + $0x30] sm:$0xff]  ;;  %v219_v23 = vld [vmem:[%s200_s29 + $0x38] sm:$0xff] }
  0x13   : > { %543 = vmatpush.msra.mxu1 %v232_v3  ;;  %v778_v24 = vld [vmem:[%s1005_s2] ss:$0 sm:$0xff] }
  0x14   : > { %696 = vmatpush.xpose.msk.msra.mxu0 %vm237_vm0, %v233_v2  ;;  %740 = vmatpush.xpose.msk.msra.mxu2 %vm237_vm0, %v233_v2 }
  0x15   : > { %741 = vmatpush.xpose.msk.msra.mxu3 %vm237_vm0, %v233_v2  ;;  %544 = vmatpush.msra.mxu1 %v231_v4 }
  0x17   : > { %545 = vmatpush.msra.mxu1 %v230_v5 }
  0x18   : > { %697 = vmatpush.xpose.msk.msra.mxu0 %vm237_vm0, %v232_v3  ;;  %742 = vmatpush.xpose.msk.msra.mxu2 %vm237_vm0, %v232_v3 }
  0x19   : > { %743 = vmatpush.xpose.msk.msra.mxu3 %vm237_vm0, %v232_v3  ;;  %546 = vmatpush.msra.mxu1 %v229_v6 }
  0x1b   : > { %547 = vmatpush.msra.mxu1 %v228_v7 }
  0x1c   : > { %698 = vmatpush.xpose.msk.msra.mxu0 %vm237_vm0, %v231_v4  ;;  %744 = vmatpush.xpose.msk.msra.mxu2 %vm237_vm0, %v231_v4 }
  0x1d   : > { %745 = vmatpush.xpose.msk.msra.mxu3 %vm237_vm0, %v231_v4  ;;  %548 = vmatpush.msra.mxu1 %v227_v8 }
  0x1f   : > { %549 = vmatpush.msra.mxu1 %v226_v9 }
  0x20   : > { %699 = vmatpush.xpose.msk.msra.mxu0 %vm237_vm0, %v230_v5  ;;  %746 = vmatpush.xpose.msk.msra.mxu2 %vm237_vm0, %v230_v5 }
  0x21   : > { %747 = vmatpush.xpose.msk.msra.mxu3 %vm237_vm0, %v230_v5  ;;  %550 = vmatpush.msra.mxu1 %v225_v10 }
  0x23   : > { %551 = vmatpush.msra.mxu1 %v224_v11 }
  0x24   : > { %700 = vmatpush.xpose.msk.msra.mxu0 %vm237_vm0, %v229_v6  ;;  %748 = vmatpush.xpose.msk.msra.mxu2 %vm237_vm0, %v229_v6 }
  0x25   : > { %749 = vmatpush.xpose.msk.msra.mxu3 %vm237_vm0, %v229_v6  ;;  %552 = vmatpush.msra.mxu1 %v223_v12 }
  0x27   : > { %553 = vmatpush.msra.mxu1 %v222_v13 }
  0x28   : > { %701 = vmatpush.xpose.msk.msra.mxu0 %vm237_vm0, %v228_v7  ;;  %750 = vmatpush.xpose.msk.msra.mxu2 %vm237_vm0, %v228_v7 }
  0x29   : > { %751 = vmatpush.xpose.msk.msra.mxu3 %vm237_vm0, %v228_v7  ;;  %554 = vmatpush.msra.mxu1 %v221_v14 }
  0x2b   : > { %555 = vmatpush.msra.mxu1 %v220_v15 }
  0x2c   : > { %702 = vmatpush.xpose.msk.msra.mxu0 %vm237_vm0, %v227_v8  ;;  %752 = vmatpush.xpose.msk.msra.mxu2 %vm237_vm0, %v227_v8 }
  0x2d   : > { %753 = vmatpush.xpose.msk.msra.mxu3 %vm237_vm0, %v227_v8 }
  0x30   : > { %703 = vmatpush.xpose.msk.msra.mxu0 %vm237_vm0, %v226_v9  ;;  %754 = vmatpush.xpose.msk.msra.mxu2 %vm237_vm0, %v226_v9 }
  0x31   : > { %755 = vmatpush.xpose.msk.msra.mxu3 %vm237_vm0, %v226_v9 }
  0x34   : > { %704 = vmatpush.xpose.msk.msra.mxu0 %vm237_vm0, %v225_v10  ;;  %756 = vmatpush.xpose.msk.msra.mxu2 %vm237_vm0, %v225_v10 }
  0x35   : > { %757 = vmatpush.xpose.msk.msra.mxu3 %vm237_vm0, %v225_v10 }
  0x38   : > { %705 = vmatpush.xpose.msk.msra.mxu0 %vm237_vm0, %v224_v11  ;;  %758 = vmatpush.xpose.msk.msra.mxu2 %vm237_vm0, %v224_v11 }
  0x39   : > { %759 = vmatpush.xpose.msk.msra.mxu3 %vm237_vm0, %v224_v11 }
  0x3c   : > { %706 = vmatpush.xpose.msk.msra.mxu0 %vm237_vm0, %v223_v12  ;;  %760 = vmatpush.xpose.msk.msra.mxu2 %vm237_vm0, %v223_v12 }
  0x3d   : > { %761 = vmatpush.xpose.msk.msra.mxu3 %vm237_vm0, %v223_v12 }
  0x40   : > { %707 = vmatpush.xpose.msk.msra.mxu0 %vm237_vm0, %v222_v13  ;;  %762 = vmatpush.xpose.msk.msra.mxu2 %vm237_vm0, %v222_v13 }
  0x41   : > { %763 = vmatpush.xpose.msk.msra.mxu3 %vm237_vm0, %v222_v13 }
  0x44   : > { %708 = vmatpush.xpose.msk.msra.mxu0 %vm237_vm0, %v221_v14  ;;  %764 = vmatpush.xpose.msk.msra.mxu2 %vm237_vm0, %v221_v14 }
  0x45   : > { %765 = vmatpush.xpose.msk.msra.mxu3 %vm237_vm0, %v221_v14 }
  0x48   : > { %709 = vmatpush.xpose.msk.msra.mxu0 %vm237_vm0, %v220_v15  ;;  %766 = vmatpush.xpose.msk.msra.mxu2 %vm237_vm0, %v220_v15 }
  0x49   : > { %767 = vmatpush.xpose.msk.msra.mxu3 %vm237_vm0, %v220_v15 }
  0x4b   : > { %710 = vmatmul.msk.f32.vlgmr.msra.gmra.mxu0 %vm237_vm0, %v212_v16  ;;  %711 = vmatmul.msk.f32.vlgmr.msra.gmra.mxu2 %vm237_vm0, %v213_v17 }
  0x4c   : > { %714 = vmatmul.msk.f32.vlgmr.msra.gmra.mxu3 %vm237_vm0, %v216_v18 }
  0x53   : > { %712 = vmatmul.msk.f32.gmra.mxu2 %vm237_vm0, %v214_v19 }
  0x54   : > { %715 = vmatmul.msk.f32.gmra.mxu3 %vm237_vm0, %v217_v20 }
  0x5b   : > { %713 = vmatmul.msk.f32.gmra.mxu2 %vm237_vm0, %v215_v21 }
  0x5c   : > { %716 = vmatmul.msk.f32.gmra.mxu3 %vm237_vm0, %v218_v22 }
  0x64   : > { %717 = vmatmul.msk.f32.gmra.mxu3 %vm237_vm0, %v219_v23 }
  0xc8   : > { %v327_v25 = vpop.f32.mrf.mxu0 }
  0xc9   : > { %v351_v26 = vmul.f32 2.0, %v327_v25 }
  0xcb   : > { %v362_v27 = vsub.f32 %v778_v24, %v351_v26 }
  0xcd   : > { %370 = vmin.xlane.f32.xlu0 %v362_v27 }
  0xce   : > { %v330_v28 = vpop.f32.mrf.mxu2 }
  0xcf   : > { %v352_v29 = vmul.f32 2.0, %v330_v28  ;;  %v339_v30 = vpop.f32.mrf.mxu3 }
  0xd0   : > { %v355_v31 = vmul.f32 2.0, %v339_v30 }
  0xd1   : > { %v363_v32 = vsub.f32 %v778_v24, %v352_v29 }
  0xd2   : > { %v366_v33 = vsub.f32 %v778_v24, %v355_v31 }
  0xd4   : > { %378 = vmin.xlane.f32.xlu2 %v366_v33 }
  0xd5   : > { %372 = vmin.xlane.f32.xlu0 %v363_v32 }
  0xd6   : > { %v333_v34 = vpop.f32.mrf.mxu2 }
  0xd7   : > { %v353_v35 = vmul.f32 2.0, %v333_v34  ;;  %v342_v36 = vpop.f32.mrf.mxu3 }
  0xd8   : > { %v356_v37 = vmul.f32 2.0, %v342_v36 }
  0xd9   : > { %v364_v38 = vsub.f32 %v778_v24, %v353_v35 }
  0xda   : > { %v367_v39 = vsub.f32 %v778_v24, %v356_v37 }
  0xdb   : > { %374 = vmin.xlane.f32.xlu1 %v364_v38 }
  0xdc   : > { %380 = vmin.xlane.f32.xlu2 %v367_v39 }
  0xde   : > { %v336_v40 = vpop.f32.mrf.mxu2 }
  0xdf   : > { %v354_v41 = vmul.f32 2.0, %v336_v40  ;;  %v345_v42 = vpop.f32.mrf.mxu3 }
  0xe0   : > { %v357_v44 = vmul.f32 2.0, %v345_v42 }
  0xe1   : > { %v365_v43 = vsub.f32 %v778_v24, %v354_v41 }
  0xe2   : > { %v368_v45 = vsub.f32 %v778_v24, %v357_v44 }
  0xe3   : > { %376 = vmin.xlane.f32.xlu1 %v365_v43 }
  0xe7   : > { %v348_v51 = vpop.f32.mrf.mxu3 }
  0xe8   : > { %v358_v54 = vmul.f32 2.0, %v348_v51 }
  0xea   : > { %v369_v57 = vsub.f32 %v778_v24, %v358_v54  ;;  %v787_v54 = vmov 1.0  }
  0xeb   : > { %382 = vmin.xlane.f32.xlu1 %v368_v45 }
 0x140   : > { %v371_v48 = vpop.xlane.xlu0 %370 }
 0x141   : > { %vm388_vm1 = vcmp.le.f32.partialorder %v362_v27, %v371_v48 }
 0x142   : > { %v396_v49 = vsel %vm388_vm1, %v940_v47, 128 }
 0x143   : > { %v405_v50 = vshra.s32 %v396_v49, 16  ;;  %v404_v15 = vand.u32 65535, %v396_v49 }
 0x145   : > { %v407_v52 = vcvt.s32.f32 %v405_v50  ;;  %v406_v17 = vcvt.s32.f32 %v404_v15 }
 0x147   : > { %v379_v53 = vpop.xlane.xlu2 %378  ;;  %408 = vmin.xlane.f32.xlu0 %v407_v52 }
 0x148   : > { %v373_v55 = vpop.xlane.xlu0 %372  ;;  %vm392_vm3 = vcmp.le.f32.partialorder %v366_v33, %v379_v53 }
 0x149   : > { %vm389_vm2 = vcmp.le.f32.partialorder %v363_v32, %v373_v55  ;;  %v400_v60 = vsel %vm392_vm3, %v940_v47, 128 }
 0x14a   : > { %v397_v56 = vsel %vm389_vm2, %v940_v47, 128  ;;  %v461_v1 = vshra.s32 %v400_v60, 16  ;;  %v460_v30 = vand.u32 65535, %v400_v60 }
 0x14b   : > { %v419_v58 = vshra.s32 %v397_v56, 16  ;;  %v418_v19 = vand.u32 65535, %v397_v56 }
 0x14c   : > { %v463_v4 = vcvt.s32.f32 %v461_v1  ;;  %v462_v35 = vcvt.s32.f32 %v460_v30 }
 0x14d   : > { %v421_v59 = vcvt.s32.f32 %v419_v58  ;;  %v420_v22 = vcvt.s32.f32 %v418_v19 }
 0x14e   : > { %v375_v61 = vpop.xlane.xlu1 %374 }
 0x14f   : > { %v381_v62 = vpop.xlane.xlu2 %380  ;;  %vm390_vm4 = vcmp.le.f32.partialorder %v364_v38, %v375_v61  ;;  %384 = vmin.xlane.f32.xlu0 %v369_v57  ;;  %422 = vmin.xlane.f32.xlu2 %v421_v59 }
 0x150   : > { %v398_v63 = vsel %vm390_vm4, %v940_v47, 128  ;;  %vm393_vm5 = vcmp.le.f32.partialorder %v367_v39, %v381_v62 }
 0x151   : > { %v433_v0 = vshra.s32 %v398_v63, 16  ;;  %v401_v3 = vsel %vm393_vm5, %v940_v47, 128  ;;  %v432_v23 = vand.u32 65535, %v398_v63  ;;  %v788_v63 = vmov 0.0  }
 0x152   : > { %v475_v6 = vshra.s32 %v401_v3, 16  ;;  %v474_v33 = vand.u32 65535, %v401_v3 }
 0x153   : > { %v435_v2 = vcvt.s32.f32 %v433_v0  ;;  %v434_v29 = vcvt.s32.f32 %v432_v23 }
 0x154   : > { %v477_v9 = vcvt.s32.f32 %v475_v6  ;;  %v476_v39 = vcvt.s32.f32 %v474_v33 }
 0x155   : > { %436 = vmin.xlane.f32.xlu1 %v435_v2 }
 0x156   : > { %v377_v5 = vpop.xlane.xlu1 %376 }
 0x157   : > { %vm391_vm6 = vcmp.le.f32.partialorder %v365_v43, %v377_v5  ;;  %464 = vmin.xlane.f32.xlu0 %v463_v4 }
 0x158   : > { %v399_v7 = vsel %vm391_vm6, %v940_v47, 128 }
 0x159   : > { %v447_v8 = vshra.s32 %v399_v7, 16  ;;  %v446_v34 = vand.u32 65535, %v399_v7 }
 0x15b   : > { %v449_v10 = vcvt.s32.f32 %v447_v8  ;;  %v448_v40 = vcvt.s32.f32 %v446_v34 }
 0x15d   : > { %478 = vmin.xlane.f32.xlu1 %v477_v9  ;;  %450 = vmin.xlane.f32.xlu2 %v449_v10 }
 0x15e   : > { %v383_v11 = vpop.xlane.xlu1 %382 }
 0x15f   : > { %vm394_vm7 = vcmp.le.f32.partialorder %v368_v45, %v383_v11 }
 0x160   : > { %v402_v12 = vsel %vm394_vm7, %v940_v47, 128 }
 0x161   : > { %v489_v13 = vshra.s32 %v402_v12, 16  ;;  %v488_v43 = vand.u32 65535, %v402_v12 }
 0x163   : > { %v491_v14 = vcvt.s32.f32 %v489_v13  ;;  %v490_v45 = vcvt.s32.f32 %v488_v43 }
 0x165   : > { %492 = vmin.xlane.f32.xlu0 %v491_v14 }
 0x1ba   : > { %v409_v16 = vpop.xlane.xlu0 %408 }
 0x1bb   : > { %vm410_vm8 = vcmp.eq.f32.partialorder %v407_v52, %v409_v16  ;;  %v415_v48 = vcvt.f32.s32 %v409_v16 }
 0x1bc   : > { %v411_v18 = vsel %vm410_vm8, %v406_v17, inf }
 0x1bd   : > { %412 = vmin.xlane.f32.xlu2 %v411_v18  ;;  %v416_v50 = vshll.u32 %v415_v48, 16 }
 0x1c2   : > { %v423_v20 = vpop.xlane.xlu2 %422  ;;  %v385_v21 = vpop.xlane.xlu0 %384 }
 0x1c3   : > { %vm395_vm9 = vcmp.le.f32.partialorder %v369_v57, %v385_v21  ;;  %vm424_vm10 = vcmp.eq.f32.partialorder %v421_v59, %v423_v20  ;;  %v429_v53 = vcvt.f32.s32 %v423_v20 }
 0x1c4   : > { %v403_v24 = vsel %vm395_vm9, %v940_v47, 128  ;;  %v425_v25 = vsel %vm424_vm10, %v420_v22, inf }
 0x1c5   : > { %426 = vmin.xlane.f32.xlu1 %v425_v25  ;;  %v503_v26 = vshra.s32 %v403_v24, 16  ;;  %v502_v55 = vand.u32 65535, %v403_v24  ;;  %v430_v57 = vshll.u32 %v429_v53, 16 }
 0x1c7   : > { %v505_v27 = vcvt.s32.f32 %v503_v26  ;;  %v504_v62 = vcvt.s32.f32 %v502_v55 }
 0x1c8   : > { %v437_v28 = vpop.xlane.xlu1 %436 }
 0x1c9   : > { %506 = vmin.xlane.f32.xlu2 %v505_v27  ;;  %vm438_vm11 = vcmp.eq.f32.partialorder %v435_v2, %v437_v28  ;;  %v443_v59 = vcvt.f32.s32 %v437_v28 }
 0x1ca   : > { %v465_v31 = vpop.xlane.xlu0 %464  ;;  %v439_v32 = vsel %vm438_vm11, %v434_v29, inf }
 0x1cb   : > { %440 = vmin.xlane.f32.xlu0 %v439_v32  ;;  %vm466_vm12 = vcmp.eq.f32.partialorder %v463_v4, %v465_v31  ;;  %v444_v4 = vshll.u32 %v443_v59, 16  ;;  %v471_v7 = vcvt.f32.s32 %v465_v31 }
 0x1cc   : > { %v467_v38 = vsel %vm466_vm12, %v462_v35, inf }
 0x1cd   : > { %v472_v13 = vshll.u32 %v471_v7, 16 }
 0x1d0   : > { %v479_v36 = vpop.xlane.xlu1 %478  ;;  %v451_v37 = vpop.xlane.xlu2 %450 }
 0x1d1   : > { %468 = vmin.xlane.f32.xlu2 %v467_v38  ;;  %vm480_vm13 = vcmp.eq.f32.partialorder %v477_v9, %v479_v36  ;;  %vm452_vm14 = vcmp.eq.f32.partialorder %v449_v10, %v451_v37  ;;  %v485_v9 = vcvt.f32.s32 %v479_v36  ;;  %v457_v10 = vcvt.f32.s32 %v451_v37 }
 0x1d2   : > { %v481_v41 = vsel %vm480_vm13, %v476_v39, inf  ;;  %v453_v42 = vsel %vm452_vm14, %v448_v40, inf }
 0x1d3   : > { %482 = vmin.xlane.f32.xlu0 %v481_v41  ;;  %454 = vmin.xlane.f32.xlu1 %v453_v42  ;;  %v486_v16 = vshll.u32 %v485_v9, 16  ;;  %v458_v19 = vshll.u32 %v457_v10, 16 }
 0x1d8   : > { %v950_v44 = vpop.xlane.xlu0 %492 }
 0x1d9   : > { %vm494_vm15 = vcmp.eq.f32.partialorder %v491_v14, %v950_v44  ;;  %v499_v25 = vcvt.f32.s32 %v950_v44 }
 0x1da   : > { %v495_v46 = vsel %vm494_vm15, %v490_v45, inf }
 0x1db   : > { %496 = vmin.xlane.f32.xlu1 %v495_v46  ;;  %v500_v30 = vshll.u32 %v499_v25, 16 }
 0x230   : > { %v413_v49 = vpop.xlane.xlu2 %412 }
 0x231   : > { %v414_v51 = vcvt.f32.s32 %v413_v49 }
 0x233   : > { %v417_v52 = vadd.s32 %v416_v50, %v414_v51 }
 0x235   : > { %vm516_vm1 = vcmp.eq.s32.totalorder %v940_v47, %v417_v52 }
 0x236   : > { %726 = vmatmul.msk.f32.vlgmr.msra.gmra.mxu1 %vm516_vm1, %v787_v54  ;;  %v718_v0 = vsel %vm516_vm1, 1.0, %v788_v63 }
 0x238   : > { %v427_v56 = vpop.xlane.xlu1 %426 }
 0x239   : > { %v428_v58 = vcvt.f32.s32 %v427_v56 }
 0x23b   : > { %v431_v60 = vadd.s32 %v430_v57, %v428_v58 }
 0x23c   : > { %v507_v61 = vpop.xlane.xlu2 %506 }
 0x23d   : > { %vm517_vm2 = vcmp.eq.s32.totalorder %v940_v47, %v431_v60  ;;  %vm508_vm3 = vcmp.eq.f32.partialorder %v505_v27, %v507_v61  ;;  %v513_v38 = vcvt.f32.s32 %v507_v61 }
 0x23e   : > { %v719_v1 = vsel %vm517_vm2, 1.0, %v788_v63  ;;  %727 = vmatmul.msk.f32.gmra.mxu1 %vm517_vm2, %v787_v54  ;;  %v441_v2 = vpop.xlane.xlu0 %440  ;;  %v509_v3 = vsel %vm508_vm3, %v504_v62, inf }
 0x23f   : > { %v589_v5 = vadd.f32 %v719_v1, %v718_v0  ;;  %v442_v6 = vcvt.f32.s32 %v441_v2  ;;  %510 = vmin.xlane.f32.xlu2 %v509_v3  ;;  %v514_v40 = vshll.u32 %v513_v38, 16 }
 0x241   : > { %v445_v8 = vadd.s32 %v444_v4, %v442_v6 }
 0x243   : > { %vm518_vm4 = vcmp.eq.s32.totalorder %v940_v47, %v445_v8 }
 0x244   : > { %v469_v11 = vpop.xlane.xlu2 %468  ;;  %v720_v12 = vsel %vm518_vm4, 1.0, %v788_v63 }
 0x245   : > { %v470_v14 = vcvt.f32.s32 %v469_v11  ;;  %v590_v15 = vadd.f32 %v720_v12, %v589_v5 }
 0x246   : > { %v455_v17 = vpop.xlane.xlu1 %454  ;;  %728 = vmatmul.msk.f32.gmra.mxu1 %vm518_vm4, %v787_v54  ;;  %v483_v18 = vpop.xlane.xlu0 %482 }
 0x247   : > { %v473_v20 = vadd.s32 %v472_v13, %v470_v14  ;;  %v456_v21 = vcvt.f32.s32 %v455_v17  ;;  %v484_v22 = vcvt.f32.s32 %v483_v18 }
 0x249   : > { %v459_v23 = vadd.s32 %v458_v19, %v456_v21  ;;  %v487_v24 = vadd.s32 %v486_v16, %v484_v22  ;;  %vm520_vm6 = vcmp.eq.s32.totalorder %v940_v47, %v473_v20 }
 0x24a   : > { %v722_v29 = vsel %vm520_vm6, 1.0, %v788_v63 }
 0x24b   : > { %vm519_vm5 = vcmp.eq.s32.totalorder %v940_v47, %v459_v23  ;;  %vm521_vm7 = vcmp.eq.s32.totalorder %v940_v47, %v487_v24 }
 0x24c   : > { %v721_v26 = vsel %vm519_vm5, 1.0, %v788_v63  ;;  %v723_v33 = vsel %vm521_vm7, 1.0, %v788_v63 }
 0x24d   : > { %v591_v27 = vadd.f32 %v721_v26, %v590_v15 }
 0x24e   : > { %v497_v28 = vpop.xlane.xlu1 %496  ;;  %729 = vmatmul.msk.f32.gmra.mxu1 %vm519_vm5, %v787_v54 }
 0x24f   : > { %v498_v31 = vcvt.f32.s32 %v497_v28  ;;  %v592_v32 = vadd.f32 %v722_v29, %v591_v27 }
 0x251   : > { %v501_v34 = vadd.s32 %v500_v30, %v498_v31  ;;  %v593_v35 = vadd.f32 %v723_v33, %v592_v32 }
 0x253   : > { %vm522_vm8 = vcmp.eq.s32.totalorder %v940_v47, %v501_v34 }
 0x254   : > { %v724_v36 = vsel %vm522_vm8, 1.0, %v788_v63 }
 0x255   : > { %v594_v37 = vadd.f32 %v724_v36, %v593_v35 }
 0x256   : > { %730 = vmatmul.msk.f32.gmra.mxu1 %vm520_vm6, %v787_v54 }
 0x25e   : > { %731 = vmatmul.msk.f32.gmra.mxu1 %vm521_vm7, %v787_v54 }
 0x266   : > { %732 = vmatmul.msk.f32.gmra.mxu1 %vm522_vm8, %v787_v54 }
 0x2b2   : > { %v511_v39 = vpop.xlane.xlu2 %510 }
 0x2b3   : > { %v512_v41 = vcvt.f32.s32 %v511_v39  ;;  %v557_v42 = vpop.f32.mrf.mxu1 }
 0x2b4   : > { %581 = vst.msk [vmem:[%s206_s8] sm:$0xff] %vm237_vm0, %v557_v42 }
 0x2b5   : > { %v515_v43 = vadd.s32 %v514_v40, %v512_v41 }
 0x2b7   : > { %vm523_vm9 = vcmp.eq.s32.totalorder %v940_v47, %v515_v43 }
 0x2b8   : > { %v725_v44 = vsel %vm523_vm9, 1.0, %v788_v63  ;;  %733 = vmatmul.msk.f32.gmra.mxu1 %vm523_vm9, %v787_v54 }
 0x2b9   : > { %v595_v45 = vadd.f32 %v725_v44, %v594_v37 }
 0x2bb   : > { %596 = vst [vmem:[%s211_s12] sm:$0xff] %v595_v45  ;;  %v560_v46 = vpop.f32.mrf.mxu1 }
 0x2bc   : > { %582 = vst.msk [vmem:[%s206_s8 + $0x8] sm:$0xff] %vm237_vm0, %v560_v46 }
 0x2c3   : > { %v563_v48 = vpop.f32.mrf.mxu1 }
 0x2c4   : > { %583 = vst.msk [vmem:[%s206_s8 + $0x10] sm:$0xff] %vm237_vm0, %v563_v48 }
 0x2cb   : > { %v566_v49 = vpop.f32.mrf.mxu1 }
 0x2cc   : > { %584 = vst.msk [vmem:[%s206_s8 + $0x18] sm:$0xff] %vm237_vm0, %v566_v49 }
 0x2d3   : > { %v569_v47 = vpop.f32.mrf.mxu1 }
 0x2d4   : > { %585 = vst.msk [vmem:[%s206_s8 + $0x20] sm:$0xff] %vm237_vm0, %v569_v47 }
 0x2db   : > { %v572_v50 = vpop.f32.mrf.mxu1 }
 0x2dc   : > { %586 = vst.msk [vmem:[%s206_s8 + $0x28] sm:$0xff] %vm237_vm0, %v572_v50 }
 0x2e3   : > { %v575_v51 = vpop.f32.mrf.mxu1 }
 0x2e4   : > { %587 = vst.msk [vmem:[%s206_s8 + $0x30] sm:$0xff] %vm237_vm0, %v575_v51 }
 0x335   : > { %v578_v52 = vpop.f32.mrf.mxu1 }
 0x336   : > { %588 = vst.msk [vmem:[%s206_s8 + $0x38] sm:$0xff] %vm237_vm0, %v578_v52 }
 0x337 PF: > { %s15_s15 = sadd.s32 1, %s785_s15  }
 0x338   : > { %p12_p5 = scmp.ge.s32.totalorder %s15_s15, 4  }
 0x33a   :  { %14 = sbr.rel (!%p12_p5) target bundleno = 1 (0x1), region = 74 }

</bundles_post_ra>
